<compile_context>
chip_gen: v6e
topology: v6e:2x2x1
jax: 0.10.0
libtpu: 0.0.40
codegen_flags: <defaults>
</compile_context>

<pallas_src>
import jax
import jax.numpy as jnp
from jax.experimental import pallas as pl
from jax.experimental.pallas import tpu as pltpu


def _copy_kernel(x_ref, o_ref):
    # Plain tile copy: the flatten happened (metadata-only) in the wrapper, so
    # no reshape / relayout happens inside VMEM — just full-vreg vld/vst.
    o_ref[...] = x_ref[...]


def _sublane(itemsize: int) -> int:
    # Dtype-aware sublane alignment: sub-32-bit dtypes pack along sublanes.
    # f32 -> 8, bf16 -> 16, int8/fp8 -> 32.
    return max(8, 32 // max(1, itemsize))


def _tile_budget_bytes() -> int:
    """Per-buffer tile budget, generation-aware."""
    try:
        vmem = pltpu.get_tpu_info().vmem_capacity_bytes
    except Exception:  # non-TPU tracing / API drift — fall back conservatively
        vmem = 128 << 20
    # v7x-class (64 MiB VMEM, ~3.2 TB/s HBM): 4 MiB halves per-step overhead and
    # 4 live double-buffered buffers (16 MiB) fit the 32 MiB scoped default.
    # v5e/v6e (128 MiB VMEM): 2 MiB keeps 4 buffers (8 MiB) under v5e's 16 MiB
    # scoped default and is at v6e's measured copy-roofline knee.
    return (4 << 20) if vmem <= (64 << 20) else (2 << 20)


def _largest_divisor_multiple_of(total: int, base: int, cap: int):
    """Largest multiple of `base` that divides `total` and is <= cap (or None)."""
    best = None
    w = base
    limit = min(total, cap)
    while w <= limit:
        if total % w == 0:
            best = w
        w += base
    return best


def _choose_slab(total: int, itemsize: int, budget: int):
    """Copy-friendly slab (rows, width): rows*width == total, width % 128 == 0.

    Prefers the widest lane dim such that (a) a `sub`-row tile of that width
    still fits the per-buffer budget and (b) there are >= `sub` rows (full
    sublane tiles).  Returns None when total is not a multiple of 128.
    """
    if total % 128 != 0:
        return None
    sub = _sublane(itemsize)
    w_cap = max(128, (budget // (sub * itemsize)) // 128 * 128)
    # Prefer widths leaving at least `sub` full rows.
    w = _largest_divisor_multiple_of(total, 128, min(w_cap, max(128, total // sub)))
    if w is None:
        w = _largest_divisor_multiple_of(total, 128, w_cap)
    if w is None:
        return None
    return total // w, w


def _choose_tiles(rows: int, cols: int, itemsize: int, budget: int):
    """Bounded (TM, TN): TN a multiple of 128 (or full extent when cols < 128),
    TM a dtype-aware sublane multiple (or full extent when rows < sub).
    Ragged tails are handled by pl.cdiv + Pallas block masking."""
    sub = _sublane(itemsize)
    if cols < 128:
        tn = cols                                   # full extent (allowed)
    else:
        tn_cap = max(128, (budget // (sub * itemsize)) // 128 * 128)
        tn = min(tn_cap, (cols // 128) * 128)       # lane-dense, <= cols
    if rows < sub:
        tm = rows                                   # full extent (allowed)
    else:
        tm_cap = max(sub, (budget // (tn * itemsize)) // sub * sub)
        tm = min(tm_cap, (rows // sub) * sub)       # sublane-aligned, <= rows
    return tm, tn


def flatten(x: jax.Array) -> jax.Array:
    n = x.shape[0]
    flat = 1
    for d in x.shape[1:]:
        flat *= d
    total = n * flat
    itemsize = jnp.dtype(x.dtype).itemsize

    if total == 0:
        return jnp.reshape(x, (n, flat))            # nothing to copy

    budget = _tile_budget_bytes()
    slab = _choose_slab(total, itemsize, budget)
    if slab is None:
        # No 128-divisible slab: tile the logical (N, FLAT) view directly with
        # bounded, aligned blocks; cdiv + masking covers the ragged tail.
        rows, cols = n, flat
    else:
        rows, cols = slab

    tm, tn = _choose_tiles(rows, cols, itemsize, budget)
    grid = (pl.cdiv(rows, tm), pl.cdiv(cols, tn))

    # Row-major-preserving reshape to the copy-friendly slab (same element
    # order as torch .view(x.size(0), -1)).
    x2 = jnp.reshape(x, (rows, cols))

    out = pl.pallas_call(
        _copy_kernel,
        out_shape=jax.ShapeDtypeStruct((rows, cols), x.dtype),
        grid=grid,
        in_specs=[pl.BlockSpec((tm, tn), lambda i, j: (i, j))],
        out_specs=pl.BlockSpec((tm, tn), lambda i, j: (i, j)),
        compiler_params=pltpu.CompilerParams(
            dimension_semantics=("parallel", "parallel")),
        cost_estimate=pl.CostEstimate(
            flops=0,
            transcendentals=0,
            bytes_accessed=2 * total * itemsize),
    )(x2)

    # Metadata-only reshape from the slab back to the logical flatten shape.
    return jnp.reshape(out, (n, flat))


if __name__ == "__main__":
    key = jax.random.PRNGKey(0)
    # Module has no parameters; deterministic NCHW input.
    x = jax.random.normal(key, (2, 4, 16, 16), dtype=jnp.float32)

    out = flatten(x)
    out = jax.block_until_ready(out)

    # Sanity-check against plain JAX reshape (same semantics as torch .view).
    ref = x.reshape(x.shape[0], -1)
    assert out.shape == (2, 4 * 16 * 16), out.shape
    assert out.dtype == x.dtype
    assert jnp.array_equal(out, ref)

    print("KERNEL_OK")
</pallas_src>

<mosaic_0001>
module attributes {stable_mosaic.version = 11 : i64} {
  func.func @_copy_kernel(%arg0: i32, %arg1: i32, %arg2: memref<8x256xf32, #tpu.memory_space<vmem>>, %arg3: memref<8x256xf32, #tpu.memory_space<vmem>>) attributes {dimension_semantics = [#tpu.dimension_semantics<parallel>, #tpu.dimension_semantics<parallel>], iteration_bounds = array<i64: 1, 1>, scalar_prefetch = 0 : i64, scratch_operands = 0 : i64, tpu.core_type = #tpu.core_type<tc>, window_params = [{transform_indices = @transform_0, window_bounds = array<i64: 8, 256>}, {transform_indices = @transform_1, window_bounds = array<i64: 8, 256>}]} {
    %c0 = arith.constant 0 : index
    %c0_0 = arith.constant 0 : index
    %0 = vector.load %arg2[%c0, %c0_0] : memref<8x256xf32, #tpu.memory_space<vmem>>, vector<8x256xf32>
    %c0_1 = arith.constant 0 : index
    %c0_2 = arith.constant 0 : index
    %1 = vector.load %arg3[%c0_1, %c0_2] : memref<8x256xf32, #tpu.memory_space<vmem>>, vector<8x256xf32>
    tpu.vector_store %arg3[%c0_1, %c0_2], %0 {strides = array<i32>} : memref<8x256xf32, #tpu.memory_space<vmem>>, vector<8x256xf32>,
    return
  }
  func.func @transform_0(%arg0: i32, %arg1: i32) -> (i32, i32) {
    %c0_i32 = arith.constant 0 : i32
    return %arg0, %arg1 : i32, i32
  }
  func.func @transform_1(%arg0: i32, %arg1: i32) -> (i32, i32) {
    %c0_i32 = arith.constant 0 : i32
    return %arg0, %arg1 : i32, i32
  }
}

</mosaic_0001>

<bundles_post_ra>
// kernel: tpu_custom_call.1
= control target key start
LH: loop header
LB: loop body
LE: loop exit
PB: predicated region body
PF: predicated region fallthrough
CT: control target
= control target key end

     0   :  { %6 = vsyncpa [#allocation3], 0  ;;  %s104_s0 = inlined_call_operand.hbm [shape: f32[8,256], index: 0, kind: input, shape index: {}]   ;;  %s105_s1 = inlined_call_operand.hbm [shape: f32[8,256], index: 1, kind: output, shape index: {}]  }
   0x1   :  { %7 = vsyncpa [#allocation4], 0  ;;  %s86_s6 = smov [#allocation2]  }
   0x2   :  { %s14_s7 = sshll.u32 %s86_s6, 4  ;;  %s15_s7 = int_to_ptr.vmem [resolvable:$true] %s14_s7 }
   0x3   :  { %s50_s8 = scalar_lea.vmem %s15_s7, 256  ;;  %p55_p1 = scmp.lt.s32.totalorder %s15_s7, %s15_s7 }
   0x4   :  { %p51_p0 = scmp.ne.s32.totalorder %s15_s7, %s50_s8  ;;  %p56_p2 = scmp.lt.s32.totalorder %s50_s8, %s50_s8 }
   0x6   :  { %p57_p3 = por %p56_p2, %p55_p1 }
   0x8   :  { %p58_p4 = pnand %p57_p3, %p51_p0 }
   0xa   :  { %61 = shalt.err (!%p58_p4)
}
   0xb   :  { %17 = dma.hbm_to_vmem [thread:$0]  %s104_s0, 256, %s15_s7, [#allocation3]  }
   0xc   :  { %82 = dma.done.wait [#allocation3], 256  }
   0xd   :  { %83 = vsyncadd [#allocation3], 4294967040  ;;  %s87_s11 = smov [#allocation5]   ;;  %v21_v0 = vld [vmem:[#allocation2] sm:$0xff]  ;;  %v22_v1 = vld [vmem:[#allocation2 + $0x8] sm:$0xff] }
   0xe   :  { %s31_s12 = sshll.u32 %s87_s11, 4  ;;  %23 = vst [vmem:[#allocation5] sm:$0xff] %v21_v0  ;;  %24 = vst [vmem:[#allocation5 + $0x8] sm:$0xff] %v22_v1  ;;  %s32_s12 = int_to_ptr.vmem [resolvable:$true] %s31_s12 }
   0xf   :  { %s62_s13 = scalar_lea.vmem %s32_s12, 256  ;;  %p67_p6 = scmp.lt.s32.totalorder %s32_s12, %s32_s12 }
  0x10   :  { %p63_p5 = scmp.ne.s32.totalorder %s32_s12, %s62_s13  ;;  %p68_p7 = scmp.lt.s32.totalorder %s62_s13, %s62_s13 }
  0x12   :  { %p69_p8 = por %p68_p7, %p67_p6 }
  0x14   :  { %p70_p9 = pnand %p69_p8, %p63_p5 }
  0x16   :  { %73 = shalt.err (!%p70_p9)
}
  0x17   :  { %34 = dma.vmem_to_hbm [thread:$0]  %s32_s12, 256, %s105_s1, [#allocation4]  }
  0x18   :  { %84 = dma.done.wait [#allocation4], 256  }
  0x19   :  { %85 = vsyncadd [#allocation4], 4294967040 }
  0x1a   :  { %38 = vsyncpa [#allocation3], 1 }
  0x1b   :  { %39 = vsyncpa [#allocation4], 1 }

</bundles_post_ra>
